<compile_context>
chip_gen: v7x
topology: tpu7x:2x2x1
jax: 0.10.0
libtpu: 0.0.40
codegen_flags: <defaults>
</compile_context>

<pallas_src>
import jax
import jax.numpy as jnp
from jax.experimental import pallas as pl
from jax.experimental.pallas import tpu as pltpu


_VMEM_LIMIT_BYTES = 32 * 1024 * 1024  # explicit scoped-VMEM request (safe on v5e/v6e/v7x)


# --------------------------- tile-size helpers ------------------------------


def _round_up(x, m):
    return ((x + m - 1) // m) * m


def _pick_pass1_rows(np_, budget_bytes=4 * 1024 * 1024):
    """Row-strip height TM for the degree pass: a (TM, Np) f32 tile stays under
    ~4 MiB (double-buffered by BlockSpec -> ~8 MiB, under the 32 MiB limit),
    preferring >= 2 strips so v7x megacore can shard the pass."""
    cap = max(8, budget_bytes // (4 * np_))
    cands = [t for t in (1024, 512, 256, 128, 64, 32, 16, 8)
             if t <= cap and np_ % t == 0]
    if not cands:          # np_ is a multiple of 128, so 8 always divides
        return 8
    two = [t for t in cands if np_ // t >= 2]
    return two[0] if two else cands[0]


def _pick_pass2_tiles(np_):
    """(TM, TN) for the scaling pass.  Both are multiples of 128 dividing Np
    (required so the swapped (TN, TM) A^T block is layout-legal).

    Np <= 1024: full-width row strips (TN = Np), TM chosen to give >= 2 strips
    (v7x megacore) while keeping one f32 tile <= ~2 MiB.
    Np  > 1024: largest of 512/256/128 square tiles (512 is the measured
    roofline sweet spot; 128 only for Np not divisible by 256)."""
    if np_ <= 1024:
        tn = np_
        budget_elems = (2 * 1024 * 1024) // 4
        cands = [t for t in range(np_, 0, -128) if np_ % t == 0]  # descending
        good = [t for t in cands if np_ // t >= 2 and t * tn <= budget_elems]
        if good:
            tm = good[0]
        else:
            ok = [t for t in cands if t * tn <= budget_elems]
            tm = ok[0] if ok else cands[-1]
        return tm, tn
    if np_ % 512 == 0:
        return 512, 512
    if np_ % 256 == 0:
        return 256, 256
    return 128, 128


# ------------------------------- kernels ------------------------------------


def _degree_kernel(adj_ref, rowsum_ref):
    # adj_ref: (TM, Np), rowsum_ref: (TM, 1)
    rowsum_ref[...] = jnp.sum(adj_ref[...], axis=1, keepdims=True)


def _degree_sym_kernel(adj_ref, rowsum_ref, colsum_ref):
    # adj_ref: (TM, Np); rowsum_ref: (TM, 1); colsum_ref: (1, 1, Np) per-strip
    # partial (no shared accumulator -> grid axis can be "parallel" on v7x).
    a = adj_ref[...]
    rowsum_ref[...] = jnp.sum(a, axis=1, keepdims=True)
    colsum_ref[...] = jnp.sum(a, axis=0, keepdims=True)[None]


def _maybe_add_diag(o_ref, rcol, rrow):
    """Add r[i] * I * r[j] on tiles that intersect the global diagonal."""
    i = pl.program_id(0)
    j = pl.program_id(1)
    tm, tn = o_ref.shape
    row0 = i * tm
    col0 = j * tn

    @pl.when((row0 < col0 + tn) & (col0 < row0 + tm))
    def _():
        gr = row0 + jax.lax.broadcasted_iota(jnp.int32, (tm, tn), 0)
        gc = col0 + jax.lax.broadcasted_iota(jnp.int32, (tm, tn), 1)
        eye = (gr == gc).astype(o_ref.dtype)
        o_ref[...] += (rcol * eye) * rrow


def _scale_kernel(a_ref, rcol_ref, rrow_ref, o_ref):
    rcol = rcol_ref[...]            # (TM, 1)
    rrow = rrow_ref[...]            # (1, TN)
    o_ref[...] = (rcol * a_ref[...]) * rrow
    _maybe_add_diag(o_ref, rcol, rrow)


def _scale_sym_kernel(a_ref, at_ref, rcol_ref, rrow_ref, o_ref):
    rcol = rcol_ref[...]            # (TM, 1)
    rrow = rrow_ref[...]            # (1, TN)
    # at_ref is the (j, i) block of A, shape (TN, TM); the tile-local transpose
    # (XLU vxpose) yields A^T's (i, j) block.  (On v5e, if this binds, drop the
    # square tile to 256 or move to the triangular-pair scheme -- see TODO.)
    m = a_ref[...] + at_ref[...].T
    o_ref[...] = (rcol * m) * rrow
    _maybe_add_diag(o_ref, rcol, rrow)


# ------------------------------- wrappers ------------------------------------


def estimate_adj_forward(estimated_adj):
    # forward() just returns the parameter; a copy kernel would only add an
    # HBM->VMEM->HBM round trip (2*N^2*4 bytes), so return it directly.
    return estimated_adj


def estimate_adj_normalize(estimated_adj, symmetric=False):
    n = estimated_adj.shape[0]
    adj = estimated_adj.astype(jnp.float32)

    # Pad to a multiple of 128 (zero padding is neutral: padded rows/cols add
    # nothing to any degree, and padded output entries are sliced away).
    np_ = _round_up(n, 128)
    if np_ != n:
        adj = jnp.pad(adj, ((0, np_ - n), (0, np_ - n)))

    # ---------------- pass 1: degree (rowsum, + colsum partials if symmetric) -
    tm1 = _pick_pass1_rows(np_)
    n_strips = np_ // tm1
    adj_row_spec = pl.BlockSpec((tm1, np_), lambda i: (i, 0))
    rowsum_spec = pl.BlockSpec((tm1, 1), lambda i: (i, 0))
    cparams1 = pltpu.CompilerParams(
        dimension_semantics=("parallel",),
        vmem_limit_bytes=_VMEM_LIMIT_BYTES)

    if symmetric:
        colsum_spec = pl.BlockSpec((1, 1, np_), lambda i: (i, 0, 0))
        rowsum, colsum_parts = pl.pallas_call(
            _degree_sym_kernel,
            grid=(n_strips,),
            in_specs=[adj_row_spec],
            out_specs=(rowsum_spec, colsum_spec),
            out_shape=(
                jax.ShapeDtypeStruct((np_, 1), jnp.float32),
                jax.ShapeDtypeStruct((n_strips, 1, np_), jnp.float32),
            ),
            compiler_params=cparams1,
        )(adj)
        # rowsum(A + A^T) = rowsum(A) + colsum(A); reduce the per-strip partials
        # here (O(N^2 / TM) floats) instead of a serial in-kernel accumulator.
        deg = rowsum[:, 0] + jnp.sum(colsum_parts, axis=(0, 1)) + jnp.float32(1.0)
    else:
        rowsum = pl.pallas_call(
            _degree_kernel,
            grid=(n_strips,),
            in_specs=[adj_row_spec],
            out_specs=rowsum_spec,
            out_shape=jax.ShapeDtypeStruct((np_, 1), jnp.float32),
            compiler_params=cparams1,
        )(adj)
        deg = rowsum[:, 0] + jnp.float32(1.0)

    # O(N) glue: rsqrt with inf -> 0 masking (matches rowsum ** -0.5; isinf mask).
    r_inv = jax.lax.rsqrt(deg)
    r_inv = jnp.where(jnp.isinf(r_inv), jnp.float32(0.0), r_inv)
    r_col = r_inv.reshape(np_, 1)
    r_row = r_inv.reshape(1, np_)

    # ---------------- pass 2: out = r[i] * (A_ij [+ A_ji^T] [+ I]) * r[j] -----
    tm, tn = _pick_pass2_tiles(np_)
    grid2 = (np_ // tm, np_ // tn)
    a_spec = pl.BlockSpec((tm, tn), lambda i, j: (i, j))
    rcol_spec = pl.BlockSpec((tm, 1), lambda i, j: (i, 0))   # re-DMA only on i change
    rrow_spec = pl.BlockSpec((1, tn), lambda i, j: (0, j))   # resident when tn == Np
    out_spec = pl.BlockSpec((tm, tn), lambda i, j: (i, j))
    cparams2 = pltpu.CompilerParams(
        dimension_semantics=("parallel", "parallel"),
        vmem_limit_bytes=_VMEM_LIMIT_BYTES)

    if symmetric:
        at_spec = pl.BlockSpec((tn, tm), lambda i, j: (j, i))   # swapped-index fetch
        out = pl.pallas_call(
            _scale_sym_kernel,
            grid=grid2,
            in_specs=[a_spec, at_spec, rcol_spec, rrow_spec],
            out_specs=out_spec,
            out_shape=jax.ShapeDtypeStruct((np_, np_), jnp.float32),
            compiler_params=cparams2,
        )(adj, adj, r_col, r_row)
    else:
        out = pl.pallas_call(
            _scale_kernel,
            grid=grid2,
            in_specs=[a_spec, rcol_spec, rrow_spec],
            out_specs=out_spec,
            out_shape=jax.ShapeDtypeStruct((np_, np_), jnp.float32),
            compiler_params=cparams2,
        )(adj, r_col, r_row)

    if np_ != n:
        out = out[:n, :n]
    return out


# --------------------------- reference (pure JAX) ----------------------------


def _normalize_ref(adj, symmetric=False):
    a = adj + adj.T if symmetric else adj
    n = a.shape[0]
    m = a + jnp.eye(n, dtype=a.dtype)
    rowsum = m.sum(1)
    r_inv = rowsum ** -0.5
    r_inv = jnp.where(jnp.isinf(r_inv), 0.0, r_inv)
    return (jnp.diag(r_inv) @ m) @ jnp.diag(r_inv)


# ---------------------------------- main --------------------------------------


if __name__ == "__main__":
    key = jax.random.PRNGKey(0)

    # N=384: multiple of 128 (no padding); exercises the full-width row-strip
    # pass-2 path with 3 strips.  N=200: exercises the pad-to-256 path.
    for N in (384, 200):
        k = jax.random.fold_in(key, N)
        # Deterministic synthetic adjacency (sparse-ish 0/1 matrix, zero diagonal).
        probs = jax.random.uniform(k, (N, N))
        adj = (probs < 0.05).astype(jnp.float32)
        adj = adj * (1.0 - jnp.eye(N, dtype=jnp.float32))

        # __init__: estimated_adj parameter initialized by copying `adj`.
        estimated_adj = adj

        # forward()
        fwd = estimate_adj_forward(estimated_adj)
        jax.block_until_ready(fwd)
        assert jnp.allclose(fwd, estimated_adj)

        # normalize() (both symmetric settings), checked against pure-JAX reference.
        for symmetric in (False, True):
            out = estimate_adj_normalize(estimated_adj, symmetric=symmetric)
            jax.block_until_ready(out)
            ref = _normalize_ref(estimated_adj, symmetric=symmetric)
            assert jnp.allclose(out, ref, atol=1e-5, rtol=1e-5), (
                f"mismatch for N={N}, symmetric={symmetric}"
            )

    print("KERNEL_OK")
</pallas_src>

<mosaic_0001>
module attributes {stable_mosaic.version = 11 : i64} {
  func.func @_degree_kernel(%arg0: i32, %arg1: memref<128x384xf32, #tpu.memory_space<vmem>>, %arg2: memref<128x1xf32, #tpu.memory_space<vmem>>) attributes {dimension_semantics = [#tpu.dimension_semantics<parallel>], iteration_bounds = array<i64: 3>, scalar_prefetch = 0 : i64, scratch_operands = 0 : i64, tpu.core_type = #tpu.core_type<tc>, window_params = [{transform_indices = @transform_0, window_bounds = array<i64: 128, 384>}, {transform_indices = @transform_1, window_bounds = array<i64: 128, 1>}]} {
    %c0 = arith.constant 0 : index
    %c0_0 = arith.constant 0 : index
    %0 = vector.load %arg1[%c0, %c0_0] : memref<128x384xf32, #tpu.memory_space<vmem>>, vector<128x384xf32>
    %cst = arith.constant dense<0.000000e+00> : vector<128xf32>
    %1 = vector.multi_reduction <add>, %0, %cst [1] : vector<128x384xf32> to vector<128xf32>
    %2 = vector.shape_cast %1 : vector<128xf32> to vector<128x1xf32>
    %c0_1 = arith.constant 0 : index
    %c0_2 = arith.constant 0 : index
    %3 = vector.load %arg2[%c0_1, %c0_2] : memref<128x1xf32, #tpu.memory_space<vmem>>, vector<128x1xf32>
    tpu.vector_store %arg2[%c0_1, %c0_2], %2 {strides = array<i32>} : memref<128x1xf32, #tpu.memory_space<vmem>>, vector<128x1xf32>,
    return
  }
  func.func @transform_0(%arg0: i32) -> (i32, i32) {
    %c0_i32 = arith.constant 0 : i32
    %c0_i32_0 = arith.constant 0 : i32
    return %arg0, %c0_i32 : i32, i32
  }
  func.func @transform_1(%arg0: i32) -> (i32, i32) {
    %c0_i32 = arith.constant 0 : i32
    %c0_i32_0 = arith.constant 0 : i32
    return %arg0, %c0_i32 : i32, i32
  }
}

</mosaic_0001>

<bundles_post_ra>
// kernel: tpu_custom_call.1
= control target key start
LH: loop header
LB: loop body
LE: loop exit
PB: predicated region body
PF: predicated region fallthrough
CT: control target
= control target key end

     0   :  { %6 = vsyncpa [#allocation3], 0  ;;  %s662_s0 = inlined_call_operand.hbm [shape: f32[384,384], index: 0, kind: input, shape index: {}]   ;;  %s663_s1 = inlined_call_operand.vmem [shape: f32[384,1], index: 1, kind: output, shape index: {}]  }
   0x1   :  { %8 = vsyncpa [#allocation3 + $0x1], 0  ;;  %s471_s6 = smov 0   ;;  %s473_s7 = smov 0  }
   0x2   :  { %s475_s8 = smov 0   ;;  %s477_s9 = smov 0  }
   0x3 LB: > { %s336_s10 = sadd.s32 4294967295, %s456_s9   ;;  %s491_s11 = sadd.s32 1, %s456_s9   ;;  %s456_s9 = sphi %s477_s9, %s670_s9   ;;  %s452_s8 = sphi %s475_s8, %s669_s8   ;;  %s448_s7 = sphi %s473_s7, %s668_s7   ;;  %s444_s6 = sphi %s471_s6, %s667_s6  }
   0x4   : > { %s18_s12 = ssub.s32 %s456_s9, %s491_s11  ;;  %s21_s13 = sadd.s32 1, %s452_s8 }
   0x5   : > { %p19_p0 = scmp.eq.s32.totalorder %s18_s12, 0  ;;  %p28_p1 = scmp.ne.s32.totalorder %s452_s8, %s448_s7 }
   0x6   : > { %p29_p2 = scmp.eq.s32.totalorder %s456_s9, 0  ;;  %p34_p3 = scmp.ne.s32.totalorder %s448_s7, %s444_s6 }
   0x7   : > { %s501_s14 = scalar_select %p19_p0, %s452_s8, %s21_s13  }
   0x8   : > { %p30_p4 = por %p29_p2, %p28_p1  ;;  %p35_p5 = scmp.eq.s32.totalorder %s336_s10, 0 }
   0x9   : > { %p357_p6 = scmp.lt.s32.totalorder %s456_s9, 3  ;;  %s84_s16 = sand.u32 1, %s452_s8  }
   0xa   : > { %p506_p7 = por %p35_p5, %p34_p3  ;;  %s348_s17 = smul.u32 384, %s84_s16 }
   0xb   : > { %s349_s18 = smul.u32 6144, %s456_s9  ;;  %p512_p8 = pnand %p357_p6, %p30_p4 }
   0xc   : > { %s88_s23 = scalar_lea.vmem [#allocation2], %s348_s17  ;;  %s524_s25 = scalar_lea.sflag [#allocation3], %s84_s16 }
   0xd   : > { %s519_s22 = scalar_lea.hbm %s662_s0, %s349_s18  ;;  %s96_s24 = sshll.u32 %s88_s23, 4  ;;  %s521_s24 = int_to_ptr.vmem [resolvable:$true] %s96_s24 }
   0xe   : > { %s392_s26 = scalar_lea.hbm %s519_s22, 6144  ;;  %p394_p11 = pneg %p512_p8 }
   0xf   : > { %p393_p10 = scmp.ne.s32.totalorder %s519_s22, %s392_s26  ;;  %s397_s29 = scalar_lea.hbm %s662_s0, 18432 }
  0x10   : > { %p398_p0 = scmp.lt.u32.totalorder %s519_s22, %s662_s0  ;;  %p399_p1 = scmp.lt.u32.totalorder %s397_s29, %s392_s26 }
  0x11   : > { %p395_p12 = pnand %p394_p11, %p393_p10  ;;  %p401_p3 = scmp.lt.u32.totalorder %s392_s26, %s519_s22 }
  0x12   : > { %p400_p2 = por %p399_p1, %p398_p0 }
  0x13   : > { %p396_p13 = pneg %p395_p12 }
  0x14   : > { %p402_p4 = por %p401_p3, %p400_p2 }
  0x16   : > { %p403_p5 = pnand %p402_p4, %p396_p13 }
  0x18   : > { %406 = shalt.err (!%p403_p5)
}
  0x19   : > { %s407_s3 = scalar_lea.vmem %s521_s24, 6144  ;;  %s458_s4 = smov [#allocation2]  }
  0x1a   : > { %p408_p6 = scmp.ne.s32.totalorder %s521_s24, %s407_s3  ;;  %s412_s5 = sshll.u32 %s458_s4, 4  ;;  %s413_s5 = int_to_ptr.vmem [resolvable:$false] %s412_s5 }
  0x1b   : > { %s414_s6 = scalar_lea.vmem %s413_s5, 12288  ;;  %p415_p9 = scmp.lt.s32.totalorder %s521_s24, %s413_s5 }
  0x1c   : > { %p410_p10 = pnand %p408_p6, %p394_p11  ;;  %p416_p0 = scmp.lt.s32.totalorder %s414_s6, %s407_s3 }
  0x1e   : > { %p411_p12 = pneg %p410_p10  ;;  %p417_p1 = por %p416_p0, %p415_p9 }
  0x20   : > { %p418_p2 = pnand %p417_p1, %p411_p12 }
  0x22   : > { %421 = shalt.err (!%p418_p2)
}
  0x23   : > { %s459_s12 = smov 384   ;;  %s460_s13 = smov 24  }
  0x24   : > { %356 = dma.hbm_to_vmem [thread:$0]  (!%p512_p8), %s519_s22, 6144, %s521_s24, %s524_s25, %s459_s12, %s459_s12, %s460_s13  }
  0x25   : > { %p104_p11 = scmp.lt.s32.totalorder %s456_s9, 4  ;;  %p666_p13 = scmp.ge.s32.totalorder %s456_s9, 1 }
  0x27   : > { %p105_p3 = pnand %p666_p13, %p104_p11 }
  0x28   : > { %s110_s16 = sand.u32 (!%p105_p3), 1, %s448_s7  }
  0x29   : > { %108 = sbr.rel (%p105_p3) target bundleno = 227 (0xe3), region = 24  ;;  %s111_s18 = scalar_lea.sflag (!%p105_p3), [#allocation3], %s110_s16 }
  0x2a   : > { %s350_s17 = smul.u32 (!%p105_p3), 384, %s110_s16 }
  0x2c   : > { %s556_s20 = scalar_lea.vmem (!%p105_p3), [#allocation2], %s350_s17 }
  0x30   : > { %439 = dma.done.wait (%p506_p7), %s111_s18, 6144  }
  0x31   : > { %441 = vsyncadd (%p506_p7), %s111_s18, 4294961152  ;;  %v146_v0 = vld [vmem:[%s556_s20 + $0x30] sm:$0xff]  ;;  %v147_v1 = vld [vmem:[%s556_s20 + $0x38] sm:$0xff]  ;;  %s344_s15 = sshll.u32 %s336_s10, 4  ;;  %vm252_vm0 = vcmask 7168  }
  0x32   : > { %v148_v2 = vld [vmem:[%s556_s20 + $0x40] sm:$0xff]  ;;  %v196_v3 = vadd.f32 %v147_v1, %v146_v0  ;;  %v141_v5 = vld [vmem:[%s556_s20 + $0x8] sm:$0xff]  ;;  %v142_v6 = vld [vmem:[%s556_s20 + $0x10] sm:$0xff]  ;;  %p135_p7 = scmp.lt.s32.totalorder %s344_s15, 47 }
  0x33   : > { %v140_v4 = vld [vmem:[%s556_s20] sm:$0xff]  ;;  %v149_v8 = vld [vmem:[%s556_s20 + $0x48] sm:$0xff]  ;;  %v150_v9 = vld [vmem:[%s556_s20 + $0x50] sm:$0xff] }
  0x34   : > { %v188_v7 = vadd.f32 %v141_v5, %v140_v4  ;;  %v151_v10 = vld [vmem:[%s556_s20 + $0x58] sm:$0xff]  ;;  %v197_v11 = vadd.f32 %v196_v3, %v148_v2  ;;  %v200_v12 = vadd.f32 %v150_v9, %v149_v8  ;;  %v144_v14 = vld [vmem:[%s556_s20 + $0x20] sm:$0xff]  ;;  %v145_v15 = vld [vmem:[%s556_s20 + $0x28] sm:$0xff]  ;;  %s672_s15 = smov (!%p135_p7, %s344_s15), 47 }
  0x35   : > { %v143_v13 = vld [vmem:[%s556_s20 + $0x18] sm:$0xff]  ;;  %v156_v19 = vld [vmem:[%s556_s20 + $0x80] sm:$0xff]  ;;  %v153_v23 = vld [vmem:[%s556_s20 + $0x68] sm:$0xff]  ;;  %s345_s19 = sshll.u32 %s672_s15, 3 }
  0x36   : > { %v189_v16 = vadd.f32 %v188_v7, %v142_v6  ;;  %v192_v17 = vadd.f32 %v144_v14, %v143_v13  ;;  %v155_v18 = vld [vmem:[%s556_s20 + $0x78] sm:$0xff]  ;;  %198 = vadd.xlane.f32.xlu1 %v197_v11  ;;  %v201_v20 = vadd.f32 %v200_v12, %v151_v10  ;;  %v152_v22 = vld [vmem:[%s556_s20 + $0x60] sm:$0xff]  ;;  %v157_v25 = vld [vmem:[%s556_s20 + $0x88] sm:$0xff]  ;;  %s615_s23 = scalar_lea.vmem %s663_s1, %s345_s19 }
  0x37   : > { %v208_v21 = vadd.f32 %v156_v19, %v155_v18  ;;  %v204_v26 = vadd.f32 %v153_v23, %v152_v22  ;;  %v161_v27 = vld [vmem:[%s556_s20 + $0xa8] sm:$0xff]  ;;  %v162_v28 = vld [vmem:[%s556_s20 + $0xb0] sm:$0xff]  ;;  %v159_v31 = vld [vmem:[%s556_s20 + $0x98] sm:$0xff] }
  0x38   : > { %190 = vadd.xlane.f32.xlu0 %v189_v16  ;;  %v193_v24 = vadd.f32 %v192_v17, %v145_v15  ;;  %v154_v29 = vld [vmem:[%s556_s20 + $0x70] sm:$0xff]  ;;  %v216_v33 = vadd.f32 %v162_v28, %v161_v27  ;;  %v163_v35 = vld [vmem:[%s556_s20 + $0xb8] sm:$0xff]  ;;  %v168_v38 = vld [vmem:[%s556_s20 + $0xe0] sm:$0xff] }
  0x39   : > { %v158_v30 = vld [vmem:[%s556_s20 + $0x90] sm:$0xff]  ;;  %v209_v32 = vadd.f32 %v208_v21, %v157_v25  ;;  %v205_v34 = vadd.f32 %v204_v26, %v154_v29  ;;  %v167_v37 = vld [vmem:[%s556_s20 + $0xd8] sm:$0xff]  ;;  %v160_v39 = vld [vmem:[%s556_s20 + $0xa0] sm:$0xff] }
  0x3a   : > { %202 = vadd.xlane.f32.xlu1 %v201_v20  ;;  %v212_v36 = vadd.f32 %v159_v31, %v158_v30  ;;  %v164_v40 = vld [vmem:[%s556_s20 + $0xc0] sm:$0xff]  ;;  %v165_v41 = vld [vmem:[%s556_s20 + $0xc8] sm:$0xff]  ;;  %v217_v42 = vadd.f32 %v216_v33, %v163_v35  ;;  %v224_v43 = vadd.f32 %v168_v38, %v167_v37  ;;  %v174_v48 = vld [vmem:[%s556_s20 + $0x110] sm:$0xff] }
  0x3b   : > { %v169_v45 = vld [vmem:[%s556_s20 + $0xe8] sm:$0xff]  ;;  %v220_v46 = vadd.f32 %v165_v41, %v164_v40  ;;  %v166_v49 = vld [vmem:[%s556_s20 + $0xd0] sm:$0xff]  ;;  %v171_v51 = vld [vmem:[%s556_s20 + $0xf8] sm:$0xff] }
  0x3c   : > { %194 = vadd.xlane.f32.xlu0 %v193_v24  ;;  %v213_v44 = vadd.f32 %v212_v36, %v160_v39  ;;  %v173_v47 = vld [vmem:[%s556_s20 + $0x108] sm:$0xff]  ;;  %v170_v50 = vld [vmem:[%s556_s20 + $0xf0] sm:$0xff]  ;;  %v225_v52 = vadd.f32 %v224_v43, %v169_v45  ;;  %v175_v55 = vld [vmem:[%s556_s20 + $0x118] sm:$0xff] }
  0x3d   : > { %v232_v53 = vadd.f32 %v174_v48, %v173_v47  ;;  %v221_v54 = vadd.f32 %v220_v46, %v166_v49  ;;  %v228_v56 = vadd.f32 %v171_v51, %v170_v50  ;;  %v179_v57 = vld [vmem:[%s556_s20 + $0x138] sm:$0xff]  ;;  %v180_v58 = vld [vmem:[%s556_s20 + $0x140] sm:$0xff]  ;;  %v177_v61 = vld [vmem:[%s556_s20 + $0x128] sm:$0xff] }
  0x3e   : > { %210 = vadd.xlane.f32.xlu1 %v209_v32  ;;  %v172_v59 = vld [vmem:[%s556_s20 + $0x100] sm:$0xff]  ;;  %v240_v63 = vadd.f32 %v180_v58, %v179_v57  ;;  %v181_v1 = vld [vmem:[%s556_s20 + $0x148] sm:$0xff]  ;;  %v186_v4 = vld [vmem:[%s556_s20 + $0x170] sm:$0xff] }
  0x3f   : > { %v176_v60 = vld [vmem:[%s556_s20 + $0x120] sm:$0xff]  ;;  %v233_v62 = vadd.f32 %v232_v53, %v175_v55  ;;  %v229_v0 = vadd.f32 %v228_v56, %v172_v59  ;;  %v185_v3 = vld [vmem:[%s556_s20 + $0x168] sm:$0xff]  ;;  %v178_v5 = vld [vmem:[%s556_s20 + $0x130] sm:$0xff] }
  0x40   : > { %206 = vadd.xlane.f32.xlu0 %v205_v34  ;;  %v236_v2 = vadd.f32 %v177_v61, %v176_v60  ;;  %v182_v6 = vld [vmem:[%s556_s20 + $0x150] sm:$0xff]  ;;  %v183_v7 = vld [vmem:[%s556_s20 + $0x158] sm:$0xff]  ;;  %v241_v8 = vadd.f32 %v240_v63, %v181_v1  ;;  %v248_v9 = vadd.f32 %v186_v4, %v185_v3  ;;  %v184_v13 = vld [vmem:[%s556_s20 + $0x160] sm:$0xff] }
  0x41   : > { %v187_v11 = vld [vmem:[%s556_s20 + $0x178] sm:$0xff]  ;;  %v244_v12 = vadd.f32 %v183_v7, %v182_v6 }
  0x42   : > { %218 = vadd.xlane.f32.xlu1 %v217_v42  ;;  %v237_v10 = vadd.f32 %v236_v2, %v178_v5  ;;  %v249_v14 = vadd.f32 %v248_v9, %v187_v11 }
  0x43   : > { %v245_v15 = vadd.f32 %v244_v12, %v184_v13 }
  0x44   : > { %214 = vadd.xlane.f32.xlu0 %v213_v44 }
  0x46   : > { %226 = vadd.xlane.f32.xlu1 %v225_v52 }
  0x48   : > { %222 = vadd.xlane.f32.xlu0 %v221_v54 }
  0x4a   : > { %234 = vadd.xlane.f32.xlu1 %v233_v62 }
  0x4c   : > { %230 = vadd.xlane.f32.xlu0 %v229_v0 }
  0x4e   : > { %242 = vadd.xlane.f32.xlu1 %v241_v8 }
  0x50   : > { %238 = vadd.xlane.f32.xlu0 %v237_v10 }
  0x52   : > { %250 = vadd.xlane.f32.xlu1 %v249_v14 }
  0x54   : > { %246 = vadd.xlane.f32.xlu0 %v245_v15 }
  0xc3   : > { %v199_v16 = vpop.xlane.xlu1 %198 }
  0xc4   : > { %255 = vst.msk [vmem:[%s615_s23 + $0x10] sm:$0xff] %vm252_vm0, %v199_v16 }
  0xc5   : > { %v191_v17 = vpop.xlane.xlu0 %190 }
  0xc6   : > { %253 = vst.msk [vmem:[%s615_s23] sm:$0xff] %vm252_vm0, %v191_v17 }
  0xc7   : > { %v203_v18 = vpop.xlane.xlu1 %202 }
  0xc8   : > { %256 = vst.msk [vmem:[%s615_s23 + $0x18] sm:$0xff] %vm252_vm0, %v203_v18 }
  0xc9   : > { %v195_v19 = vpop.xlane.xlu0 %194 }
  0xca   : > { %254 = vst.msk [vmem:[%s615_s23 + $0x8] sm:$0xff] %vm252_vm0, %v195_v19 }
  0xcb   : > { %v211_v20 = vpop.xlane.xlu1 %210 }
  0xcc   : > { %258 = vst.msk [vmem:[%s615_s23 + $0x28] sm:$0xff] %vm252_vm0, %v211_v20 }
  0xcd   : > { %v207_v21 = vpop.xlane.xlu0 %206 }
  0xce   : > { %257 = vst.msk [vmem:[%s615_s23 + $0x20] sm:$0xff] %vm252_vm0, %v207_v21 }
  0xcf   : > { %v219_v22 = vpop.xlane.xlu1 %218 }
  0xd0   : > { %260 = vst.msk [vmem:[%s615_s23 + $0x38] sm:$0xff] %vm252_vm0, %v219_v22 }
  0xd1   : > { %v215_v23 = vpop.xlane.xlu0 %214 }
  0xd2   : > { %259 = vst.msk [vmem:[%s615_s23 + $0x30] sm:$0xff] %vm252_vm0, %v215_v23 }
  0xd3   : > { %v227_v24 = vpop.xlane.xlu1 %226 }
  0xd4   : > { %262 = vst.msk [vmem:[%s615_s23 + $0x48] sm:$0xff] %vm252_vm0, %v227_v24 }
  0xd5   : > { %v223_v25 = vpop.xlane.xlu0 %222 }
  0xd6   : > { %261 = vst.msk [vmem:[%s615_s23 + $0x40] sm:$0xff] %vm252_vm0, %v223_v25 }
  0xd7   : > { %v235_v26 = vpop.xlane.xlu1 %234 }
  0xd8   : > { %264 = vst.msk [vmem:[%s615_s23 + $0x58] sm:$0xff] %vm252_vm0, %v235_v26 }
  0xd9   : > { %v231_v27 = vpop.xlane.xlu0 %230 }
  0xda   : > { %263 = vst.msk [vmem:[%s615_s23 + $0x50] sm:$0xff] %vm252_vm0, %v231_v27 }
  0xdb   : > { %v243_v28 = vpop.xlane.xlu1 %242 }
  0xdc   : > { %266 = vst.msk [vmem:[%s615_s23 + $0x68] sm:$0xff] %vm252_vm0, %v243_v28 }
  0xdd   : > { %v239_v29 = vpop.xlane.xlu0 %238 }
  0xde   : > { %265 = vst.msk [vmem:[%s615_s23 + $0x60] sm:$0xff] %vm252_vm0, %v239_v29 }
  0xdf   : > { %v251_v30 = vpop.xlane.xlu1 %250 }
  0xe0   : > { %268 = vst.msk [vmem:[%s615_s23 + $0x78] sm:$0xff] %vm252_vm0, %v251_v30 }
  0xe1   : > { %v247_v31 = vpop.xlane.xlu0 %246 }
  0xe2   : > { %267 = vst.msk [vmem:[%s615_s23 + $0x70] sm:$0xff] %vm252_vm0, %v247_v31 }
  0xe3 PF: > { %p11_p8 = scmp.ge.s32.totalorder %s491_s11, 5   ;;  %s667_s6 = smov %s448_s7 }
  0xe4   : > { %s668_s7 = smov %s452_s8  ;;  %s669_s8 = smov %s501_s14 }
  0xe5   : > { %s670_s9 = smov %s491_s11  ;;  %13 = sbr.rel (!%p11_p8) target bundleno = 3 (0x3), region = 64 }
  0xec   :  { %291 = vsyncpa [#allocation3], 1 }
  0xed   :  { %293 = vsyncpa [#allocation3 + $0x1], 1 }

</bundles_post_ra>
